<compile_context>
chip_gen: v7x
topology: tpu7x:2x2x1
jax: 0.10.0
libtpu: 0.0.40
codegen_flags: <defaults>
</compile_context>

<pallas_src>
import functools

import jax
import jax.numpy as jnp
from jax import lax
from jax.experimental import pallas as pl
from jax.experimental.pallas import tpu as pltpu

EPS = 1e-5
H1 = 128          # hidden width 56 padded up to 128 (lane-dense)
H2 = 128
H3 = 256
VMEM_LIMIT = 32 * 1024 * 1024
FUSED_MAX_ROWS = 4096     # whole (padded) batch kept resident below this


# ---------------------------------------------------------------------------
# Shared MLP body: (tb, 2) -> (tb, 256) pre-BatchNorm activations (f32).
# ---------------------------------------------------------------------------
def _mlp_body(x, w_ref, p_ref):
    # Linear(2, 56->128) + ReLU on the VPU as two rank-1 updates
    # (a K=2 MXU matmul would run at 2/256 utilization).
    w1r0 = p_ref[0:1, 0:H1]                          # (1, 128)
    w1r1 = p_ref[1:2, 0:H1]
    b1 = p_ref[2:3, 0:H1]
    h1 = jnp.maximum(x[:, 0:1] * w1r0 + x[:, 1:2] * w1r1 + b1, 0.0)  # (tb,128)

    mx_dtype = w_ref.dtype            # f32, or bf16 on the large-N path

    # Linear(56->128, 128) + ReLU  (MXU, lane-dense; padded rows of w2 are 0)
    w2 = w_ref[:, 0:H2]                              # (128, 128)
    b2 = p_ref[3:4, 0:H2]
    h2 = jnp.maximum(
        jnp.dot(h1.astype(mx_dtype), w2, preferred_element_type=jnp.float32) + b2,
        0.0)                                         # (tb, 128)

    # Linear(128, 256)  (MXU)
    w3 = w_ref[:, H2:H2 + H3]                        # (128, 256)
    b3 = p_ref[4:5, :]
    h3 = jnp.dot(h2.astype(mx_dtype), w3, preferred_element_type=jnp.float32) + b3
    return h3                                        # (tb, 256) f32


# ---------------------------------------------------------------------------
# Fused single-pass kernel (small / medium N): MLP + BatchNorm + ReLU in one go.
# ---------------------------------------------------------------------------
def _fused_kernel(x_ref, w_ref, p_ref, gb_ref, o_ref, *, n_valid, nb):
    h3 = _mlp_body(x_ref[...], w_ref, p_ref)          # (nb, 256)

    if nb != n_valid:
        valid = lax.broadcasted_iota(jnp.int32, (nb, H3), 0) < n_valid
        h3s = jnp.where(valid, h3, 0.0)
    else:
        h3s = h3
    mean = jnp.sum(h3s, axis=0, keepdims=True) * (1.0 / n_valid)   # (1, 256)

    cent = h3 - mean
    if nb != n_valid:
        cent = jnp.where(valid, cent, 0.0)
    var = jnp.sum(cent * cent, axis=0, keepdims=True) * (1.0 / n_valid)

    inv = lax.rsqrt(var + EPS)                        # EUP push, ~free
    scale = gb_ref[0:1, :] * inv                      # gamma * inv_std
    shift = gb_ref[1:2, :] - mean * scale             # beta - mean*scale
    o_ref[...] = jnp.maximum(h3 * scale + shift, 0.0)


# ---------------------------------------------------------------------------
# Two-pass path, pass 1: MLP per batch tile + global BN statistics accumulation.
# ---------------------------------------------------------------------------
def _fwd_stats_kernel(x_ref, w_ref, p_ref, h3_ref, stats_ref, *, n_valid, tb):
    i = pl.program_id(0)

    @pl.when(i == 0)
    def _():
        stats_ref[...] = jnp.zeros_like(stats_ref)

    h3 = _mlp_body(x_ref[...], w_ref, p_ref)          # (tb, 256)
    h3_ref[...] = h3                                  # lane-dense store

    # TODO(synk): E[x^2]-E[x]^2 can lose precision for very large N; switch to
    # per-tile centered partial sums if that ever matters.
    def accum(h):
        stats_ref[...] += jnp.concatenate(
            [jnp.sum(h, axis=0, keepdims=True),
             jnp.sum(h * h, axis=0, keepdims=True)], axis=0)

    if n_valid % tb != 0:
        last = pl.num_programs(0) - 1

        @pl.when(i == last)                           # only the ragged tile masks
        def _():
            row = lax.broadcasted_iota(jnp.int32, (tb, H3), 0) + i * tb
            accum(jnp.where(row < n_valid, h3, 0.0))

        @pl.when(i != last)
        def _():
            accum(h3)
    else:
        accum(h3)


# ---------------------------------------------------------------------------
# Two-pass path, pass 2: fold stats -> scale/shift in-kernel, normalize + ReLU.
# ---------------------------------------------------------------------------
def _normalize_kernel(h3_ref, stats_ref, gb_ref, o_ref, *, n_valid):
    mean = stats_ref[0:1, :] * (1.0 / n_valid)
    ex2 = stats_ref[1:2, :] * (1.0 / n_valid)
    var = jnp.maximum(ex2 - mean * mean, 0.0)         # biased batch variance
    inv = lax.rsqrt(var + EPS)
    scale = gb_ref[0:1, :] * inv
    shift = gb_ref[1:2, :] - mean * scale
    o_ref[...] = jnp.maximum(h3_ref[...] * scale + shift, 0.0)


# ---------------------------------------------------------------------------
# Wrapper
# ---------------------------------------------------------------------------
def encoder_forward(x, params, *, tb=2048, use_bf16_matmul=False,
                    fused_max_rows=FUSED_MAX_ROWS):
    (w1, b1, w2, b2, w3, b3, gamma, beta) = params
    n = x.shape[0]

    # ---- pack lane-dense operand slabs (tiny one-time XLA work) ----
    # Weight slab (128, 384): cols [0:128] = w2 zero-padded 56->128 rows,
    #                         cols [128:384] = w3.
    w2p = jnp.zeros((H1, H2), jnp.float32).at[: w2.shape[0], :].set(w2)
    w_slab = jnp.concatenate([w2p, w3], axis=1)                    # (128, 384)

    # Param slab (8, 256): rows 0,1 = w1 rows (padded), 2 = b1, 3 = b2, 4 = b3.
    def pad_row(v, width=H3):
        v = v.reshape(-1)
        return jnp.zeros((1, width), jnp.float32).at[0, : v.shape[0]].set(v)

    p_slab = jnp.concatenate(
        [pad_row(w1[0]), pad_row(w1[1]), pad_row(b1), pad_row(b2), pad_row(b3),
         jnp.zeros((3, H3), jnp.float32)], axis=0)                 # (8, 256)

    # gamma/beta slab (2, 256)
    gb_slab = jnp.concatenate(
        [gamma.reshape(1, H3), beta.reshape(1, H3)], axis=0).astype(jnp.float32)

    nb = max(8, ((n + 7) // 8) * 8)                   # batch rounded to sublanes

    # ======================= fused single-pass path =========================
    if nb <= fused_max_rows:
        xp = x if nb == n else jnp.concatenate(
            [x, jnp.zeros((nb - n, 2), x.dtype)], axis=0)
        kernel = functools.partial(_fused_kernel, n_valid=n, nb=nb)
        out = pl.pallas_call(
            kernel,
            grid=(1,),
            in_specs=[
                pl.BlockSpec((nb, 2), lambda i: (0, 0)),
                pl.BlockSpec((H1, H2 + H3), lambda i: (0, 0)),
                pl.BlockSpec((8, H3), lambda i: (0, 0)),
                pl.BlockSpec((2, H3), lambda i: (0, 0)),
            ],
            out_specs=pl.BlockSpec((nb, H3), lambda i: (0, 0)),
            out_shape=jax.ShapeDtypeStruct((nb, H3), jnp.float32),
            compiler_params=pltpu.CompilerParams(
                dimension_semantics=("arbitrary",),
                vmem_limit_bytes=VMEM_LIMIT),
            cost_estimate=pl.CostEstimate(
                flops=2 * nb * (H1 * H2 + H2 * H3) + 12 * nb * H3,
                transcendentals=0,
                bytes_accessed=4 * (nb * 2 + H1 * (H2 + H3) + 10 * H3
                                    + nb * H3)),
        )(xp, w_slab, p_slab, gb_slab)
        return out[:n]

    # =========================== two-pass path ==============================
    if use_bf16_matmul:
        # bf16 MXU operands for the large-N regime; accumulation stays f32.
        w_slab = w_slab.astype(jnp.bfloat16)

    tb = min(tb, nb)
    n_pad = ((n + tb - 1) // tb) * tb
    xp = x if n_pad == n else jnp.concatenate(
        [x, jnp.zeros((n_pad - n, 2), x.dtype)], axis=0)
    num_tiles = n_pad // tb

    # ---- pass 1: MLP + global sum / sum-of-squares ----
    kernel1 = functools.partial(_fwd_stats_kernel, n_valid=n, tb=tb)
    h3, stats = pl.pallas_call(
        kernel1,
        grid=(num_tiles,),
        in_specs=[
            pl.BlockSpec((tb, 2), lambda i: (i, 0)),
            pl.BlockSpec((H1, H2 + H3), lambda i: (0, 0)),
            pl.BlockSpec((8, H3), lambda i: (0, 0)),
        ],
        out_specs=[
            pl.BlockSpec((tb, H3), lambda i: (i, 0)),
            pl.BlockSpec((2, H3), lambda i: (0, 0)),   # resident stats accumulator
        ],
        out_shape=[
            jax.ShapeDtypeStruct((n_pad, H3), jnp.float32),
            jax.ShapeDtypeStruct((2, H3), jnp.float32),
        ],
        compiler_params=pltpu.CompilerParams(
            dimension_semantics=("arbitrary",),
            vmem_limit_bytes=VMEM_LIMIT),
        cost_estimate=pl.CostEstimate(
            flops=2 * n_pad * (H1 * H2 + H2 * H3) + 8 * n_pad * H3,
            transcendentals=0,
            bytes_accessed=4 * (n_pad * 2 + H1 * (H2 + H3) + 8 * H3
                                + n_pad * H3 + 2 * H3)),
    )(xp, w_slab, p_slab)

    # ---- pass 2: stats fold + normalize + ReLU, in place over h3 ----
    kernel2 = functools.partial(_normalize_kernel, n_valid=n)
    out = pl.pallas_call(
        kernel2,
        grid=(num_tiles,),
        in_specs=[
            pl.BlockSpec((tb, H3), lambda i: (i, 0)),
            pl.BlockSpec((2, H3), lambda i: (0, 0)),
            pl.BlockSpec((2, H3), lambda i: (0, 0)),
        ],
        out_specs=pl.BlockSpec((tb, H3), lambda i: (i, 0)),
        out_shape=jax.ShapeDtypeStruct((n_pad, H3), jnp.float32),
        input_output_aliases={0: 0},                   # overwrite h3 in place
        compiler_params=pltpu.CompilerParams(
            dimension_semantics=("parallel",),
            vmem_limit_bytes=VMEM_LIMIT),
        cost_estimate=pl.CostEstimate(
            flops=3 * n_pad * H3,
            transcendentals=0,
            bytes_accessed=4 * (2 * n_pad * H3 + 4 * H3)),
    )(h3, stats, gb_slab)

    return out[:n]


# ---------------------------------------------------------------------------
# Parameter init (shapes match the PyTorch module) & pure-JAX reference.
# ---------------------------------------------------------------------------
def init_params(key):
    ks = jax.random.split(key, 6)

    def linear(kw, kb, fan_in, fan_out):
        bound = 1.0 / jnp.sqrt(fan_in)
        w = jax.random.uniform(kw, (fan_in, fan_out), jnp.float32, -bound, bound)
        b = jax.random.uniform(kb, (1, fan_out), jnp.float32, -bound, bound)
        return w, b

    w1, b1 = linear(ks[0], ks[1], 2, 56)
    w2, b2 = linear(ks[2], ks[3], 56, 128)
    w3, b3 = linear(ks[4], ks[5], 128, 256)
    gamma = jnp.ones((1, 256), jnp.float32)
    beta = jnp.zeros((1, 256), jnp.float32)
    return (w1, b1, w2, b2, w3, b3, gamma, beta)


def reference_forward(x, params):
    (w1, b1, w2, b2, w3, b3, gamma, beta) = params
    h = jnp.maximum(x @ w1 + b1, 0.0)
    h = jnp.maximum(h @ w2 + b2, 0.0)
    h = h @ w3 + b3
    mean = jnp.mean(h, axis=0, keepdims=True)
    var = jnp.mean((h - mean) ** 2, axis=0, keepdims=True)
    y = gamma * (h - mean) / jnp.sqrt(var + EPS) + beta
    return jnp.maximum(y, 0.0)


if __name__ == "__main__":
    key = jax.random.PRNGKey(0)
    k_params, k_x = jax.random.split(key)
    params = init_params(k_params)

    # Moon-dataset style input: (batch, 2) points -> fused single-kernel path.
    x_small = jax.random.normal(k_x, (64, 2), jnp.float32)
    fwd_small = jax.jit(encoder_forward)
    out_small = jax.block_until_ready(fwd_small(x_small, params))
    ref_small = reference_forward(x_small, params)
    assert out_small.shape == (64, 256)
    assert jnp.allclose(out_small, ref_small, atol=1e-4, rtol=1e-4), \
        "fused path mismatch vs reference"

    # Exercise the two-pass (tiled, global-BatchNorm) path at a small, cheap
    # shape: 300 rows with tb=128 -> 3 tiles incl. a masked partial tile.
    x_big = jax.random.normal(jax.random.PRNGKey(1), (300, 2), jnp.float32)
    fwd_big = jax.jit(functools.partial(encoder_forward, tb=128, fused_max_rows=0))
    out_big = jax.block_until_ready(fwd_big(x_big, params))
    ref_big = reference_forward(x_big, params)
    assert out_big.shape == (300, 256)
    assert jnp.allclose(out_big, ref_big, atol=1e-3, rtol=1e-3), \
        "two-pass path mismatch vs reference"

    print("KERNEL_OK")
</pallas_src>

<mosaic_0001>
module attributes {stable_mosaic.version = 11 : i64} {
  func.func @_fused_kernel(%arg0: i32, %arg1: memref<64x2xf32, #tpu.memory_space<vmem>>, %arg2: memref<128x384xf32, #tpu.memory_space<vmem>>, %arg3: memref<8x256xf32, #tpu.memory_space<vmem>>, %arg4: memref<2x256xf32, #tpu.memory_space<vmem>>, %arg5: memref<64x256xf32, #tpu.memory_space<vmem>>) attributes {dimension_semantics = [#tpu.dimension_semantics<arbitrary>], iteration_bounds = array<i64: 1>, scalar_prefetch = 0 : i64, scratch_operands = 0 : i64, tpu.core_type = #tpu.core_type<tc>, window_params = [{pipeline_mode = #tpu.pipeline_mode<synchronous>, transform_indices = @transform_0, window_bounds = array<i64: 64, 2>}, {pipeline_mode = #tpu.pipeline_mode<synchronous>, transform_indices = @transform_1, window_bounds = array<i64: 128, 384>}, {pipeline_mode = #tpu.pipeline_mode<synchronous>, transform_indices = @transform_2, window_bounds = array<i64: 8, 256>}, {pipeline_mode = #tpu.pipeline_mode<synchronous>, transform_indices = @transform_3, window_bounds = array<i64: 2, 256>}, {pipeline_mode = #tpu.pipeline_mode<synchronous>, transform_indices = @transform_4, window_bounds = array<i64: 64, 256>}]} {
    %c0 = arith.constant 0 : index
    %c0_0 = arith.constant 0 : index
    %0 = vector.load %arg1[%c0, %c0_0] : memref<64x2xf32, #tpu.memory_space<vmem>>, vector<64x2xf32>
    %c0_1 = arith.constant 0 : index
    %c0_2 = arith.constant 0 : index
    %1 = vector.load %arg3[%c0_1, %c0_2] : memref<8x256xf32, #tpu.memory_space<vmem>>, vector<1x128xf32>
    %c1 = arith.constant 1 : index
    %c0_3 = arith.constant 0 : index
    %2 = vector.load %arg3[%c1, %c0_3] : memref<8x256xf32, #tpu.memory_space<vmem>>, vector<1x128xf32>
    %c2 = arith.constant 2 : index
    %c0_4 = arith.constant 0 : index
    %3 = vector.load %arg3[%c2, %c0_4] : memref<8x256xf32, #tpu.memory_space<vmem>>, vector<1x128xf32>
    %4 = vector.extract_strided_slice %0 {offsets = [0, 0], sizes = [64, 1], strides = [1, 1]} : vector<64x2xf32> to vector<64x1xf32>
    %5 = vector.broadcast %4 : vector<64x1xf32> to vector<64x128xf32>
    %6 = vector.broadcast %1 : vector<1x128xf32> to vector<64x128xf32>
    %7 = arith.mulf %5, %6 : vector<64x128xf32>
    %8 = vector.extract_strided_slice %0 {offsets = [0, 1], sizes = [64, 1], strides = [1, 1]} : vector<64x2xf32> to vector<64x1xf32>
    %9 = vector.broadcast %8 : vector<64x1xf32> to vector<64x128xf32>
    %10 = vector.broadcast %2 : vector<1x128xf32> to vector<64x128xf32>
    %11 = arith.mulf %9, %10 : vector<64x128xf32>
    %12 = arith.addf %7, %11 : vector<64x128xf32>
    %13 = vector.broadcast %3 : vector<1x128xf32> to vector<64x128xf32>
    %14 = arith.addf %12, %13 : vector<64x128xf32>
    %cst = arith.constant 0.000000e+00 : f32
    %15 = vector.broadcast %cst : f32 to vector<64x128xf32>
    %16 = arith.maximumf %14, %15 : vector<64x128xf32>
    %c0_5 = arith.constant 0 : index
    %c0_6 = arith.constant 0 : index
    %17 = vector.load %arg2[%c0_5, %c0_6] : memref<128x384xf32, #tpu.memory_space<vmem>>, vector<128x128xf32>
    %c3 = arith.constant 3 : index
    %c0_7 = arith.constant 0 : index
    %18 = vector.load %arg3[%c3, %c0_7] : memref<8x256xf32, #tpu.memory_space<vmem>>, vector<1x128xf32>
    %cst_8 = arith.constant dense<0.000000e+00> : vector<64x128xf32>
    %19 = tpu.matmul %16, %17, %cst_8 {dimension_numbers = #tpu.dot_dimension_numbers<[1], [0], [0], [1], [0, 0, 1, 1], [], []>} : vector<64x128xf32>, vector<128x128xf32>, vector<64x128xf32> -> vector<64x128xf32>
    %20 = vector.broadcast %18 : vector<1x128xf32> to vector<64x128xf32>
    %21 = arith.addf %19, %20 : vector<64x128xf32>
    %cst_9 = arith.constant 0.000000e+00 : f32
    %22 = vector.broadcast %cst_9 : f32 to vector<64x128xf32>
    %23 = arith.maximumf %21, %22 : vector<64x128xf32>
    %c0_10 = arith.constant 0 : index
    %c128 = arith.constant 128 : index
    %24 = vector.load %arg2[%c0_10, %c128] : memref<128x384xf32, #tpu.memory_space<vmem>>, vector<128x256xf32>
    %c4 = arith.constant 4 : index
    %c0_11 = arith.constant 0 : index
    %25 = vector.load %arg3[%c4, %c0_11] : memref<8x256xf32, #tpu.memory_space<vmem>>, vector<1x256xf32>
    %cst_12 = arith.constant dense<0.000000e+00> : vector<64x256xf32>
    %26 = tpu.matmul %23, %24, %cst_12 {dimension_numbers = #tpu.dot_dimension_numbers<[1], [0], [0], [1], [0, 0, 1, 1], [], []>} : vector<64x128xf32>, vector<128x256xf32>, vector<64x256xf32> -> vector<64x256xf32>
    %27 = vector.broadcast %25 : vector<1x256xf32> to vector<64x256xf32>
    %28 = arith.addf %26, %27 : vector<64x256xf32>
    %cst_13 = arith.constant dense<0.000000e+00> : vector<256xf32>
    %29 = vector.multi_reduction <add>, %28, %cst_13 [0] : vector<64x256xf32> to vector<256xf32>
    %30 = vector.shape_cast %29 : vector<256xf32> to vector<1x256xf32>
    %cst_14 = arith.constant 1.562500e-02 : f32
    %31 = vector.broadcast %cst_14 : f32 to vector<1x256xf32>
    %32 = arith.mulf %30, %31 : vector<1x256xf32>
    %33 = vector.broadcast %32 : vector<1x256xf32> to vector<64x256xf32>
    %34 = arith.subf %28, %33 : vector<64x256xf32>
    %35 = arith.mulf %34, %34 : vector<64x256xf32>
    %cst_15 = arith.constant dense<0.000000e+00> : vector<256xf32>
    %36 = vector.multi_reduction <add>, %35, %cst_15 [0] : vector<64x256xf32> to vector<256xf32>
    %37 = vector.shape_cast %36 : vector<256xf32> to vector<1x256xf32>
    %cst_16 = arith.constant 1.562500e-02 : f32
    %38 = vector.broadcast %cst_16 : f32 to vector<1x256xf32>
    %39 = arith.mulf %37, %38 : vector<1x256xf32>
    %cst_17 = arith.constant 9.99999974E-6 : f32
    %40 = vector.broadcast %cst_17 : f32 to vector<1x256xf32>
    %41 = arith.addf %39, %40 : vector<1x256xf32>
    %42 = math.rsqrt %41 : vector<1x256xf32>
    %c0_18 = arith.constant 0 : index
    %c0_19 = arith.constant 0 : index
    %43 = vector.load %arg4[%c0_18, %c0_19] : memref<2x256xf32, #tpu.memory_space<vmem>>, vector<1x256xf32>
    %44 = arith.mulf %43, %42 : vector<1x256xf32>
    %c1_20 = arith.constant 1 : index
    %c0_21 = arith.constant 0 : index
    %45 = vector.load %arg4[%c1_20, %c0_21] : memref<2x256xf32, #tpu.memory_space<vmem>>, vector<1x256xf32>
    %46 = arith.mulf %32, %44 : vector<1x256xf32>
    %47 = arith.subf %45, %46 : vector<1x256xf32>
    %48 = vector.broadcast %44 : vector<1x256xf32> to vector<64x256xf32>
    %49 = arith.mulf %28, %48 : vector<64x256xf32>
    %50 = vector.broadcast %47 : vector<1x256xf32> to vector<64x256xf32>
    %51 = arith.addf %49, %50 : vector<64x256xf32>
    %cst_22 = arith.constant 0.000000e+00 : f32
    %52 = vector.broadcast %cst_22 : f32 to vector<64x256xf32>
    %53 = arith.maximumf %51, %52 : vector<64x256xf32>
    %c0_23 = arith.constant 0 : index
    %c0_24 = arith.constant 0 : index
    %54 = vector.load %arg5[%c0_23, %c0_24] : memref<64x256xf32, #tpu.memory_space<vmem>>, vector<64x256xf32>
    tpu.vector_store %arg5[%c0_23, %c0_24], %53 {strides = array<i32>} : memref<64x256xf32, #tpu.memory_space<vmem>>, vector<64x256xf32>,
    return
  }
  func.func @transform_0(%arg0: i32) -> (i32, i32) {
    %c0_i32 = arith.constant 0 : i32
    %c0_i32_0 = arith.constant 0 : i32
    %c0_i32_1 = arith.constant 0 : i32
    return %c0_i32, %c0_i32_0 : i32, i32
  }
  func.func @transform_1(%arg0: i32) -> (i32, i32) {
    %c0_i32 = arith.constant 0 : i32
    %c0_i32_0 = arith.constant 0 : i32
    %c0_i32_1 = arith.constant 0 : i32
    return %c0_i32, %c0_i32_0 : i32, i32
  }
  func.func @transform_2(%arg0: i32) -> (i32, i32) {
    %c0_i32 = arith.constant 0 : i32
    %c0_i32_0 = arith.constant 0 : i32
    %c0_i32_1 = arith.constant 0 : i32
    return %c0_i32, %c0_i32_0 : i32, i32
  }
  func.func @transform_3(%arg0: i32) -> (i32, i32) {
    %c0_i32 = arith.constant 0 : i32
    %c0_i32_0 = arith.constant 0 : i32
    %c0_i32_1 = arith.constant 0 : i32
    return %c0_i32, %c0_i32_0 : i32, i32
  }
  func.func @transform_4(%arg0: i32) -> (i32, i32) {
    %c0_i32 = arith.constant 0 : i32
    %c0_i32_0 = arith.constant 0 : i32
    %c0_i32_1 = arith.constant 0 : i32
    return %c0_i32, %c0_i32_0 : i32, i32
  }
}

</mosaic_0001>

<bundles_post_ra>
// kernel: encoder_forward.1
= control target key start
LH: loop header
LB: loop body
LE: loop exit
PB: predicated region body
PF: predicated region fallthrough
CT: control target
= control target key end

     0   :  { %v840_v2 = vmov 0   ;;  %v841_v8 = vmov 1   ;;  %s1197_s0 = inlined_call_operand.vmem [shape: f32[64,2], index: 0, kind: input, shape index: {}]   ;;  %s1198_s1 = inlined_call_operand.vmem [shape: f32[128,384], index: 1, kind: input, shape index: {}]   ;;  %s1199_s2 = inlined_call_operand.vmem [shape: f32[8,256], index: 2, kind: input, shape index: {}]   ;;  %s1200_s3 = inlined_call_operand.vmem [shape: f32[2,256], index: 3, kind: input, shape index: {}]   ;;  %s1201_s4 = inlined_call_operand.hbm [shape: f32[64,256], index: 4, kind: output, shape index: {}]  }
   0x1   :  { %v19_v0 = vld [vmem:[%s1197_s0 + $0x8] sm:$0xff]  ;;  %v18_v1 = vld [vmem:[%s1197_s0] sm:$0xff]  ;;  %809 = vset.pattern.permute.xlu1 %v840_v2  ;;  %807 = vset.pattern.permute.xlu0 %v840_v2  ;;  %v142_v4 = vld [vmem:[%s1198_s1 + $0x18] sm:$0xff] }
   0x2   :  { %36 = vperm.xlu1 %809, %v19_v0   ;;  %31 = vperm.xlu0 %807, %v18_v1   ;;  %v141_v3 = vld [vmem:[%s1198_s1] sm:$0xff]  ;;  %v143_v5 = vld [vmem:[%s1198_s1 + $0x30] sm:$0xff]  ;;  %v144_v6 = vld [vmem:[%s1198_s1 + $0x48] sm:$0xff] }
   0x3   :  { %v736_v7 = vpack.c.bf16 %v142_v4, %v141_v3  ;;  %v740_v9 = vpack.c.bf16 %v144_v6, %v143_v5  ;;  %v145_v10 = vld [vmem:[%s1198_s1 + $0x60] sm:$0xff]  ;;  %v146_v11 = vld [vmem:[%s1198_s1 + $0x78] sm:$0xff]  ;;  %v20_v12 = vld [vmem:[%s1197_s0 + $0x10] sm:$0xff] }
   0x5   :  { %737 = vmatprep.subr.bf16.mxu0 %v736_v7 }
   0x6   :  { %810 = vset.pattern.permute.xlu1 %v841_v8  ;;  %808 = vset.pattern.permute.xlu0 %v841_v8 }
   0x7   :  { %82 = vperm.xlu1 %810, %v19_v0   ;;  %78 = vperm.xlu0 %808, %v18_v1  }
   0x8   :  { %9 = vsyncpa [#allocation3], 0  ;;  %739 = vmatpush3.bf16.msra.mxu0 %v736_v7  ;;  %v744_v13 = vpack.c.bf16 %v146_v11, %v145_v10  ;;  %v147_v14 = vld [vmem:[%s1198_s1 + $0x90] sm:$0xff]  ;;  %v148_v15 = vld [vmem:[%s1198_s1 + $0xa8] sm:$0xff] }
   0x9   :  { %741 = vmatprep.subr.bf16.mxu0 %v740_v9  ;;  %v21_v16 = vld [vmem:[%s1197_s0 + $0x18] sm:$0xff]  ;;  %v748_v17 = vpack.c.bf16 %v148_v15, %v147_v14  ;;  %v149_v18 = vld [vmem:[%s1198_s1 + $0xc0] sm:$0xff]  ;;  %v151_v22 = vld [vmem:[%s1198_s1 + $0xf0] sm:$0xff] }
   0xa   :  { %v150_v19 = vld [vmem:[%s1198_s1 + $0xd8] sm:$0xff]  ;;  %v22_v20 = vld [vmem:[%s1197_s0 + $0x20] sm:$0xff]  ;;  %v152_v23 = vld [vmem:[%s1198_s1 + $0x108] sm:$0xff] }
   0xb   :  { %811 = vset.pattern.permute.xlu1 %v840_v2  ;;  %86 = vperm.xlu0 %808, %v20_v12   ;;  %v752_v21 = vpack.c.bf16 %v150_v19, %v149_v18  ;;  %v23_v24 = vld [vmem:[%s1197_s0 + $0x28] sm:$0xff]  ;;  %v756_v25 = vpack.c.bf16 %v152_v23, %v151_v22  ;;  %v153_v26 = vld [vmem:[%s1198_s1 + $0x120] sm:$0xff]  ;;  %v154_v27 = vld [vmem:[%s1198_s1 + $0x138] sm:$0xff] }
   0xc   :  { %41 = vperm.xlu1 %811, %v20_v12   ;;  %743 = vmatpush3.bf16.msra.mxu0 %v740_v9  ;;  %v24_v28 = vld [vmem:[%s1197_s0 + $0x30] sm:$0xff]  ;;  %v760_v29 = vpack.c.bf16 %v154_v27, %v153_v26  ;;  %v156_v31 = vld [vmem:[%s1198_s1 + $0x168] sm:$0xff]  ;;  %v25_v32 = vld [vmem:[%s1197_s0 + $0x38] sm:$0xff] }
   0xd   :  { %745 = vmatprep.subr.bf16.mxu0 %v744_v13  ;;  %v155_v30 = vld [vmem:[%s1198_s1 + $0x150] sm:$0xff]  ;;  %v274_v35 = vld [vmem:[%s1198_s1 + $0x28] sm:$0xff]  ;;  %v273_v38 = vld [vmem:[%s1198_s1 + $0x20] sm:$0xff] }
   0xe   :  { %v764_v33 = vpack.c.bf16 %v156_v31, %v155_v30  ;;  %v272_v34 = vld [vmem:[%s1198_s1 + $0x10] sm:$0xff]  ;;  %v271_v36 = vld [vmem:[%s1198_s1 + $0x8] sm:$0xff]  ;;  %v276_v39 = vld [vmem:[%s1198_s1 + $0x40] sm:$0xff] }
   0xf   :  { %90 = vperm.xlu0 %808, %v21_v16   ;;  %v768_v37 = vpack.c.bf16 %v274_v35, %v272_v34  ;;  %v278_v40 = vld [vmem:[%s1198_s1 + $0x58] sm:$0xff]  ;;  %v770_v41 = vpack.c.bf16 %v273_v38, %v271_v36  ;;  %v277_v44 = vld [vmem:[%s1198_s1 + $0x50] sm:$0xff]  ;;  %v282_v46 = vld [vmem:[%s1198_s1 + $0x88] sm:$0xff] }
  0x10   :  { %46 = vperm.xlu1 %811, %v21_v16   ;;  %747 = vmatpush3.bf16.msra.mxu0 %v744_v13  ;;  %v772_v42 = vpack.c.bf16 %v278_v40, %v276_v39  ;;  %v275_v43 = vld [vmem:[%s1198_s1 + $0x38] sm:$0xff]  ;;  %v280_v45 = vld [vmem:[%s1198_s1 + $0x70] sm:$0xff]  ;;  %v279_v49 = vld [vmem:[%s1198_s1 + $0x68] sm:$0xff] }
  0x11   :  { %749 = vmatprep.subr.bf16.mxu0 %v748_v17  ;;  %769 = vmatprep.subr.bf16.mxu1 %v768_v37  ;;  %v774_v47 = vpack.c.bf16 %v277_v44, %v275_v43  ;;  %v776_v48 = vpack.c.bf16 %v282_v46, %v280_v45  ;;  %v281_v50 = vld [vmem:[%s1198_s1 + $0x80] sm:$0xff]  ;;  %v286_v52 = vld [vmem:[%s1198_s1 + $0xb8] sm:$0xff]  ;;  %v285_v56 = vld [vmem:[%s1198_s1 + $0xb0] sm:$0xff] }
  0x12   :  { %771 = vmatpush1.bf16.msra.mxu1 %v770_v41  ;;  %v284_v51 = vld [vmem:[%s1198_s1 + $0xa0] sm:$0xff]  ;;  %v778_v53 = vpack.c.bf16 %v281_v50, %v279_v49  ;;  %v283_v55 = vld [vmem:[%s1198_s1 + $0x98] sm:$0xff]  ;;  %v288_v57 = vld [vmem:[%s1198_s1 + $0xd0] sm:$0xff] }
  0x13   :  { %94 = vperm.xlu0 %808, %v22_v20   ;;  %773 = vmatprep.subr.bf16.mxu1 %v772_v42  ;;  %v780_v54 = vpack.c.bf16 %v286_v52, %v284_v51  ;;  %v290_v58 = vld [vmem:[%s1198_s1 + $0xe8] sm:$0xff]  ;;  %v782_v59 = vpack.c.bf16 %v285_v56, %v283_v55  ;;  %v289_v62 = vld [vmem:[%s1198_s1 + $0xe0] sm:$0xff]  ;;  %v294_v0 = vld [vmem:[%s1198_s1 + $0x118] sm:$0xff] }
  0x14   :  { %51 = vperm.xlu1 %811, %v22_v20   ;;  %751 = vmatpush3.bf16.msra.mxu0 %v748_v17  ;;  %v784_v60 = vpack.c.bf16 %v290_v58, %v288_v57  ;;  %v287_v61 = vld [vmem:[%s1198_s1 + $0xc8] sm:$0xff]  ;;  %v292_v63 = vld [vmem:[%s1198_s1 + $0x100] sm:$0xff]  ;;  %v291_v3 = vld [vmem:[%s1198_s1 + $0xf8] sm:$0xff] }
  0x15   :  { %753 = vmatprep.subr.bf16.mxu0 %v752_v21  ;;  %v786_v1 = vpack.c.bf16 %v289_v62, %v287_v61  ;;  %v788_v2 = vpack.c.bf16 %v294_v0, %v292_v63  ;;  %v293_v4 = vld [vmem:[%s1198_s1 + $0x110] sm:$0xff]  ;;  %v298_v6 = vld [vmem:[%s1198_s1 + $0x148] sm:$0xff]  ;;  %v297_v10 = vld [vmem:[%s1198_s1 + $0x140] sm:$0xff] }
  0x16   :  { %775 = vmatpush1.bf16.msra.mxu1 %v774_v47  ;;  %v296_v5 = vld [vmem:[%s1198_s1 + $0x130] sm:$0xff]  ;;  %v790_v7 = vpack.c.bf16 %v293_v4, %v291_v3  ;;  %v295_v9 = vld [vmem:[%s1198_s1 + $0x128] sm:$0xff]  ;;  %v26_v14 = vld [vmem:[%s1199_s2] ss:$0 sm:$0xff] }
  0x17   :  { %98 = vperm.xlu0 %808, %v23_v24   ;;  %777 = vmatprep.subr.bf16.mxu1 %v776_v48  ;;  %v792_v8 = vpack.c.bf16 %v298_v6, %v296_v5  ;;  %v794_v11 = vpack.c.bf16 %v297_v10, %v295_v9  ;;  %v27_v15 = vld [vmem:[%s1199_s2 + $0x1] ss:$0 sm:$0xff]  ;;  %v28_v22 = vld [vmem:[%s1199_s2 + $0x2] ss:$0 sm:$0xff]  ;;  %v299_v10 = vld [vmem:[%s1198_s1 + $0x158] sm:$0xff] }
  0x18   :  { %56 = vperm.xlu1 %811, %v23_v24   ;;  %755 = vmatpush3.bf16.msra.mxu0 %v752_v21 }
  0x19   :  { %757 = vmatprep.subr.bf16.mxu0 %v756_v25 }
  0x1a   :  { %779 = vmatpush1.bf16.msra.mxu1 %v778_v53 }
  0x1b   :  { %102 = vperm.xlu0 %808, %v24_v28   ;;  %781 = vmatprep.subr.bf16.mxu1 %v780_v54 }
  0x1c   :  { %61 = vperm.xlu1 %811, %v24_v28   ;;  %759 = vmatpush3.bf16.msra.mxu0 %v756_v25 }
  0x1d   :  { %761 = vmatprep.subr.bf16.mxu0 %v760_v29 }
  0x1e   :  { %783 = vmatpush1.bf16.msra.mxu1 %v782_v59 }
  0x1f   :  { %106 = vperm.xlu0 %808, %v25_v32   ;;  %785 = vmatprep.subr.bf16.mxu1 %v784_v60 }
  0x20   :  { %66 = vperm.xlu1 %811, %v25_v32   ;;  %763 = vmatpush3.bf16.msra.mxu0 %v760_v29 }
  0x21   :  { %765 = vmatprep.subr.bf16.mxu0 %v764_v33 }
  0x22   :  { %787 = vmatpush1.bf16.msra.mxu1 %v786_v1 }
  0x23   :  { %789 = vmatprep.subr.bf16.mxu1 %v788_v2 }
  0x24   :  { %767 = vmatpush3.bf16.msra.mxu0 %v764_v33 }
  0x26   :  { %791 = vmatpush1.bf16.msra.mxu1 %v790_v7  ;;  %v300_v7 = vld [vmem:[%s1198_s1 + $0x160] sm:$0xff] }
  0x27   :  { %793 = vmatprep.subr.bf16.mxu1 %v792_v8  ;;  %v302_v8 = vld [vmem:[%s1198_s1 + $0x178] sm:$0xff] }
  0x28   :  { %v796_v9 = vpack.c.bf16 %v302_v8, %v300_v7 }
  0x2a   :  { %795 = vmatpush1.bf16.msra.mxu1 %v794_v11  ;;  %v301_v11 = vld [vmem:[%s1198_s1 + $0x170] sm:$0xff] }
  0x2b   :  { %797 = vmatprep.subr.bf16.mxu1 %v796_v9 }
  0x81   :  { %v37_v12 = vpop.permute.xlu1 %36  ;;  %v32_v13 = vpop.permute.xlu0 %31 }
  0x82   :  { %v70_v18 = vmul.f32 %v37_v12, %v26_v14  ;;  %v69_v19 = vmul.f32 %v32_v13, %v26_v14  ;;  %v798_v12 = vpack.c.bf16 %v301_v11, %v299_v10  ;;  %v842_v13 = vmov 0.0  }
  0x83   :  { %380 = vmatprep.mubr.f32.mxu1 %v842_v13 }
  0x84   :  { %799 = vmatpush1.bf16.msra.mxu1 %v798_v12 }
  0x86   :  { %v83_v16 = vpop.permute.xlu1 %82  ;;  %v79_v17 = vpop.permute.xlu0 %78 }
  0x87   :  { %v110_v20 = vmul.f32 %v83_v16, %v27_v15  ;;  %v109_v21 = vmul.f32 %v79_v17, %v27_v15 }
  0x89   :  { %v118_v23 = vadd.f32 %v110_v20, %v70_v18  ;;  %v117_v24 = vadd.f32 %v109_v21, %v69_v19 }
  0x8a   :  { %v87_v25 = vpop.permute.xlu0 %86 }
  0x8b   :  { %v111_v26 = vmul.f32 %v87_v25, %v27_v15  ;;  %v42_v27 = vpop.permute.xlu1 %41  ;;  %v125_v28 = vadd.f32 %v117_v24, %v28_v22  ;;  %v126_v29 = vadd.f32 %v118_v23, %v28_v22 }
  0x8c   :  { %v71_v30 = vmul.f32 %v42_v27, %v26_v14 }
  0x8d   :  { %v133_v31 = vmax.f32 %v125_v28, 0.0  ;;  %v134_v32 = vmax.f32 %v126_v29, 0.0 }
  0x8e   :  { %v119_v33 = vadd.f32 %v111_v26, %v71_v30  ;;  %v91_v34 = vpop.permute.xlu0 %90 }
  0x8f   :  { %v112_v35 = vmul.f32 %v91_v34, %v27_v15  ;;  %v47_v36 = vpop.permute.xlu1 %46  ;;  %724 = vmatprep.mubr.f32.mxu0 %v133_v31 }
  0x90   :  { %v72_v37 = vmul.f32 %v47_v36, %v26_v14  ;;  %725 = vmatmul.mubr.f32.vlgmr.msra.gmra.mrb[0].mxu0 %v134_v32  ;;  %v127_v38 = vadd.f32 %v119_v33, %v28_v22 }
  0x92   :  { %v120_v39 = vadd.f32 %v112_v35, %v72_v37  ;;  %v95_v40 = vpop.permute.xlu0 %94  ;;  %v135_v41 = vmax.f32 %v127_v38, 0.0 }
  0x93   :  { %v113_v42 = vmul.f32 %v95_v40, %v27_v15  ;;  %v52_v43 = vpop.permute.xlu1 %51  ;;  %v306_v40 = vlaneseq }
  0x94   :  { %v73_v44 = vmul.f32 %v52_v43, %v26_v14  ;;  %727 = vmatprep.mubr.f32.mxu0 %v135_v41  ;;  %v128_v45 = vadd.f32 %v120_v39, %v28_v22 }
  0x95   :  { %v1052_v43 = vshrl.u32 %v306_v40, 7 }
  0x96   :  { %v121_v46 = vadd.f32 %v113_v42, %v73_v44  ;;  %v99_v47 = vpop.permute.xlu0 %98  ;;  %v136_v48 = vmax.f32 %v128_v45, 0.0 }
  0x97   :  { %v114_v49 = vmul.f32 %v99_v47, %v27_v15  ;;  %v57_v50 = vpop.permute.xlu1 %56 }
  0x98   :  { %v74_v51 = vmul.f32 %v57_v50, %v26_v14  ;;  %728 = vmatmul.mubr.f32.gmra.mrb[2].mxu0 %v136_v48  ;;  %v129_v52 = vadd.f32 %v121_v46, %v28_v22  ;;  %v1055_v46 = vsub.s32 0, %v1052_v43  ;;  %v666_v48 = vld [vmem:[%s1199_s2 + $0x4] ss:$8 sm:$0x3] }
  0x9a   :  { %v122_v53 = vadd.f32 %v114_v49, %v74_v51  ;;  %v103_v54 = vpop.permute.xlu0 %102  ;;  %v137_v55 = vmax.f32 %v129_v52, 0.0  ;;  %v1061_v49 = vsub.s32 1, %v1052_v43  ;;  %v309_v51 = vrot.slane %v666_v48, %v1055_v46 }
  0x9b   :  { %v115_v56 = vmul.f32 %v103_v54, %v27_v15  ;;  %v62_v57 = vpop.permute.xlu1 %61 }
  0x9c   :  { %v75_v58 = vmul.f32 %v62_v57, %v26_v14  ;;  %730 = vmatprep.mubr.f32.mxu0 %v137_v55  ;;  %v130_v59 = vadd.f32 %v122_v53, %v28_v22  ;;  %v313_v53 = vrot.slane %v666_v48, %v1061_v49 }
  0x9e   :  { %v123_v60 = vadd.f32 %v115_v56, %v75_v58  ;;  %v107_v61 = vpop.permute.xlu0 %106  ;;  %v138_v62 = vmax.f32 %v130_v59, 0.0 }
  0x9f   :  { %v116_v63 = vmul.f32 %v107_v61, %v27_v15  ;;  %v67_v0 = vpop.permute.xlu1 %66 }
  0xa0   :  { %v76_v1 = vmul.f32 %v67_v0, %v26_v14  ;;  %731 = vmatmul.mubr.f32.gmra.mrb[4].mxu0 %v138_v62  ;;  %v131_v2 = vadd.f32 %v123_v60, %v28_v22  ;;  %v157_v14 = vld [vmem:[%s1199_s2 + $0x3] ss:$0 sm:$0xff] }
  0xa2   :  { %v124_v3 = vadd.f32 %v116_v63, %v76_v1  ;;  %v139_v4 = vmax.f32 %v131_v2, 0.0 }
  0xa4   :  { %733 = vmatprep.mubr.f32.mxu0 %v139_v4  ;;  %v132_v5 = vadd.f32 %v124_v3, %v28_v22 }
  0xa6   :  { %v140_v6 = vmax.f32 %v132_v5, 0.0 }
  0xa8   :  { %734 = vmatmul.mubr.f32.gmra.mrb[6].mxu0 %v140_v6 }
 0x163   :  { %v726_v15 = vpop.f32.mrb[0].mxu0 }
 0x164   :  { %v224_v16 = vpop.f32.mrb[1].mxu0  ;;  %v230_v18 = vadd.f32 %v726_v15, %v157_v14 }
 0x165   :  { %v225_v17 = vadd.f32 %v224_v16, %v157_v14 }
 0x166   :  { %v264_v20 = vmax.f32 %v230_v18, 0.0 }
 0x167   :  { %v263_v19 = vmax.f32 %v225_v17, 0.0 }
 0x169   :  { %381 = vmatmul.mubr.f32.vlgmr.msra.gmra.mrb[0].mxu1 %v263_v19 }
 0x16a   :  { %386 = vmatprep.mubr.f32.mxu1 %v842_v13 }
 0x16b   :  { %v729_v21 = vpop.f32.mrb[2].mxu0 }
 0x16c   :  { %v234_v22 = vpop.f32.mrb[3].mxu0  ;;  %v240_v24 = vadd.f32 %v729_v21, %v157_v14 }
 0x16d   :  { %v235_v23 = vadd.f32 %v234_v22, %v157_v14  ;;  %387 = vmatmul.mubr.f32.gmra.mrb[2].mxu1 %v264_v20 }
 0x16e   :  { %392 = vmatprep.mubr.f32.mxu1 %v842_v13  ;;  %v266_v26 = vmax.f32 %v240_v24, 0.0 }
 0x16f   :  { %v265_v25 = vmax.f32 %v235_v23, 0.0 }
 0x171   :  { %393 = vmatmul.mubr.f32.gmra.mrb[4].mxu1 %v265_v25 }
 0x172   :  { %398 = vmatprep.mubr.f32.mxu1 %v842_v13 }
 0x173   :  { %v732_v27 = vpop.f32.mrb[4].mxu0 }
 0x174   :  { %v244_v28 = vpop.f32.mrb[5].mxu0  ;;  %v250_v30 = vadd.f32 %v732_v27, %v157_v14 }
 0x175   :  { %v245_v29 = vadd.f32 %v244_v28, %v157_v14  ;;  %399 = vmatmul.mubr.f32.gmra.mrb[6].mxu1 %v266_v26 }
 0x176   :  { %404 = vmatprep.mubr.f32.mxu1 %v842_v13  ;;  %v268_v32 = vmax.f32 %v250_v30, 0.0 }
 0x177   :  { %v267_v31 = vmax.f32 %v245_v29, 0.0 }
 0x179   :  { %405 = vmatmul.mubr.f32.gmra.mrb[8].mxu1 %v267_v31 }
 0x17a   :  { %410 = vmatprep.mubr.f32.mxu1 %v842_v13 }
 0x17b   :  { %v735_v33 = vpop.f32.mrb[6].mxu0 }
 0x17c   :  { %v254_v34 = vpop.f32.mrb[7].mxu0  ;;  %v260_v36 = vadd.f32 %v735_v33, %v157_v14 }
 0x17d   :  { %v255_v35 = vadd.f32 %v254_v34, %v157_v14  ;;  %411 = vmatmul.mubr.f32.gmra.mrb[10].mxu1 %v268_v32 }
 0x17e   :  { %416 = vmatprep.mubr.f32.mxu1 %v842_v13  ;;  %v270_v38 = vmax.f32 %v260_v36, 0.0 }
 0x17f   :  { %v269_v37 = vmax.f32 %v255_v35, 0.0 }
 0x181   :  { %417 = vmatmul.mubr.f32.gmra.mrb[12].mxu1 %v269_v37 }
 0x182   :  { %422 = vmatprep.mubr.f32.mxu1 %v842_v13 }
 0x185   :  { %423 = vmatmul.mubr.f32.gmra.mrb[14].mxu1 %v270_v38 }
 0x23c   :  { %v382_v39 = vpop.f32.mrb[0].mxu1 }
 0x23d   :  { %v384_v41 = vpop.f32.mrb[1].mxu1  ;;  %v1069_v57 = vadd.f32 %v382_v39, %v309_v51 }
 0x23e   :  { %v1073_v60 = vadd.f32 %v384_v41, %v313_v53 }
 0x240   :  { %v388_v42 = vpop.f32.mrb[2].mxu1 }
 0x241   :  { %v390_v44 = vpop.f32.mrb[3].mxu1  ;;  %v1065_v54 = vadd.f32 %v388_v42, %v309_v51 }
 0x242   :  { %v1067_v55 = vadd.f32 %v390_v44, %v313_v53 }
 0x243   :  { %v429_v62 = vadd.f32 %v1065_v54, %v1069_v57 }
 0x244   :  { %v394_v45 = vpop.f32.mrb[4].mxu1  ;;  %v442_v0 = vadd.f32 %v1067_v55, %v1073_v60 }
 0x245   :  { %v396_v47 = vpop.f32.mrb[5].mxu1  ;;  %v1071_v58 = vadd.f32 %v394_v45, %v309_v51 }
 0x246   :  { %v1075_v61 = vadd.f32 %v396_v47, %v313_v53 }
 0x247   :  { %v430_v3 = vadd.f32 %v429_v62, %v1071_v58 }
 0x248   :  { %v400_v50 = vpop.f32.mrb[6].mxu1  ;;  %v443_v6 = vadd.f32 %v442_v0, %v1075_v61 }
 0x249   :  { %v402_v52 = vpop.f32.mrb[7].mxu1  ;;  %v1079_v63 = vadd.f32 %v400_v50, %v309_v51 }
 0x24a   :  { %v1083_v1 = vadd.f32 %v402_v52, %v313_v53 }
 0x24b   :  { %v431_v8 = vadd.f32 %v430_v3, %v1079_v63 }
 0x24c   :  { %v406_v56 = vpop.f32.mrb[8].mxu1  ;;  %v444_v10 = vadd.f32 %v443_v6, %v1083_v1 }
 0x24d   :  { %v408_v59 = vpop.f32.mrb[9].mxu1  ;;  %v1086_v4 = vadd.f32 %v406_v56, %v309_v51 }
 0x24e   :  { %v1089_v7 = vadd.f32 %v408_v59, %v313_v53 }
 0x24f   :  { %v432_v13 = vadd.f32 %v431_v8, %v1086_v4 }
 0x250   :  { %v412_v2 = vpop.f32.mrb[10].mxu1  ;;  %v445_v16 = vadd.f32 %v444_v10, %v1089_v7 }
 0x251   :  { %v414_v5 = vpop.f32.mrb[11].mxu1  ;;  %v1092_v9 = vadd.f32 %v412_v2, %v309_v51 }
 0x252   :  { %v1095_v11 = vadd.f32 %v414_v5, %v313_v53 }
 0x253   :  { %v433_v18 = vadd.f32 %v432_v13, %v1092_v9 }
 0x254   :  { %v418_v12 = vpop.f32.mrb[12].mxu1  ;;  %v446_v19 = vadd.f32 %v445_v16, %v1095_v11 }
 0x255   :  { %v1098_v14 = vadd.f32 %v418_v12, %v309_v51  ;;  %v420_v15 = vpop.f32.mrb[13].mxu1 }
 0x256   :  { %v1101_v17 = vadd.f32 %v420_v15, %v313_v53 }
 0x257   :  { %v434_v21 = vadd.f32 %v433_v18, %v1098_v14 }
 0x258   :  { %v424_v20 = vpop.f32.mrb[14].mxu1  ;;  %v447_v24 = vadd.f32 %v446_v19, %v1101_v17 }
 0x259   :  { %v1106_v22 = vadd.f32 %v424_v20, %v309_v51  ;;  %v426_v23 = vpop.f32.mrb[15].mxu1 }
 0x25a   :  { %v1109_v25 = vadd.f32 %v426_v23, %v313_v53 }
 0x25b   :  { %v435_v26 = vadd.f32 %v434_v21, %v1106_v22 }
 0x25c   :  { %v448_v27 = vadd.f32 %v447_v24, %v1109_v25 }
 0x25d   :  { %v436_v28 = vrot.slane %v435_v26, 4 }
 0x25e   :  { %v449_v29 = vrot.slane %v448_v27, 4 }
 0x25f   :  { %v437_v30 = vadd.f32 %v436_v28, %v435_v26 }
 0x260   :  { %v450_v31 = vadd.f32 %v449_v29, %v448_v27 }
 0x261   :  { %v438_v32 = vrot.slane %v437_v30, 2 }
 0x262   :  { %v451_v33 = vrot.slane %v450_v31, 2 }
 0x263   :  { %v439_v34 = vadd.f32 %v438_v32, %v437_v30 }
 0x264   :  { %v452_v35 = vadd.f32 %v451_v33, %v450_v31 }
 0x265   :  { %v440_v36 = vrot.slane %v439_v34, 1 }
 0x266   :  { %v453_v37 = vrot.slane %v452_v35, 1 }
 0x267   :  { %v441_v38 = vadd.f32 %v440_v36, %v439_v34 }
 0x268   :  { %v454_v39 = vadd.f32 %v453_v37, %v452_v35 }
 0x269   :  { %v1113_v40 = vmul.f32 0.015625, %v441_v38 }
 0x26a   :  { %v1121_v45 = vmul.f32 0.015625, %v454_v39 }
 0x26b   :  { %v457_v41 = vsub.f32 %v1069_v57, %v1113_v40  ;;  %v459_v42 = vsub.f32 %v1065_v54, %v1113_v40  ;;  %v461_v44 = vsub.f32 %v1071_v58, %v1113_v40  ;;  %v463_v47 = vsub.f32 %v1079_v63, %v1113_v40 }
 0x26c   :  { %v465_v51 = vsub.f32 %v1086_v4, %v1113_v40  ;;  %v458_v56 = vsub.f32 %v1073_v60, %v1121_v45  ;;  %v460_v59 = vsub.f32 %v1067_v55, %v1121_v45  ;;  %v462_v62 = vsub.f32 %v1075_v61, %v1121_v45 }
 0x26d   :  { %v473_v48 = vmul.f32 %v457_v41, %v457_v41  ;;  %v475_v50 = vmul.f32 %v459_v42, %v459_v42  ;;  %v477_v52 = vmul.f32 %v461_v44, %v461_v44  ;;  %v467_v0 = vsub.f32 %v1092_v9, %v1113_v40 }
 0x26e   :  { %v479_v2 = vmul.f32 %v463_v47, %v463_v47  ;;  %v464_v5 = vsub.f32 %v1083_v1, %v1121_v45  ;;  %v474_v6 = vmul.f32 %v458_v56, %v458_v56  ;;  %v476_v8 = vmul.f32 %v460_v59, %v460_v59 }
 0x26f   :  { %v489_v53 = vadd.f32 %v475_v50, %v473_v48  ;;  %v469_v10 = vsub.f32 %v1098_v14, %v1113_v40  ;;  %v481_v12 = vmul.f32 %v465_v51, %v465_v51  ;;  %v466_v15 = vsub.f32 %v1089_v7, %v1121_v45 }
 0x270   :  { %v478_v16 = vmul.f32 %v462_v62, %v462_v62  ;;  %v502_v18 = vadd.f32 %v476_v8, %v474_v6  ;;  %v471_v19 = vsub.f32 %v1106_v22, %v1113_v40  ;;  %v483_v20 = vmul.f32 %v467_v0, %v467_v0 }
 0x271   :  { %v490_v3 = vadd.f32 %v489_v53, %v477_v52  ;;  %v468_v23 = vsub.f32 %v1095_v11, %v1121_v45  ;;  %v480_v24 = vmul.f32 %v464_v5, %v464_v5  ;;  %v485_v27 = vmul.f32 %v469_v10, %v469_v10 }
 0x272   :  { %v503_v26 = vadd.f32 %v502_v18, %v478_v16  ;;  %v470_v29 = vsub.f32 %v1101_v17, %v1121_v45  ;;  %v482_v30 = vmul.f32 %v466_v15, %v466_v15  ;;  %v487_v32 = vmul.f32 %v471_v19, %v471_v19 }
 0x273   :  { %v491_v13 = vadd.f32 %v490_v3, %v479_v2  ;;  %v472_v34 = vsub.f32 %v1109_v25, %v1121_v45  ;;  %v484_v35 = vmul.f32 %v468_v23, %v468_v23  ;;  %v521_v23 = vld [vmem:[%s1200_s3] ss:$2 sm:$0x3] }
 0x274   :  { %v504_v31 = vadd.f32 %v503_v26, %v480_v24  ;;  %v486_v38 = vmul.f32 %v470_v29, %v470_v29 }
 0x275   :  { %v492_v21 = vadd.f32 %v491_v13, %v481_v12  ;;  %v488_v42 = vmul.f32 %v472_v34, %v472_v34  ;;  %v843_v12 = vmov 1966171168  }
 0x276   :  { %v505_v36 = vadd.f32 %v504_v31, %v482_v30  ;;  %v526_v13 = vunpack.c.l.s4 %v843_v12 }
 0x277   :  { %v493_v28 = vadd.f32 %v492_v21, %v483_v20 }
 0x278   :  { %v506_v39 = vadd.f32 %v505_v36, %v484_v35  ;;  %v527_v15 = vunpack.c.0.s8 %v526_v13 }
 0x279   :  { %v494_v33 = vadd.f32 %v493_v28, %v485_v27 }
 0x27a   :  { %v507_v44 = vadd.f32 %v506_v39, %v486_v38  ;;  %v530_v18 = vsub.s32 %v527_v15, %v1052_v43  ;;  %v667_v43 = vld [vmem:[%s1200_s3 + $0x1] ss:$2 sm:$0x3]  ;;  %s844_s3 = smov [#allocation2]  }
 0x27b   :  { %v495_v37 = vadd.f32 %v494_v33, %v487_v32  ;;  %s655_s6 = sshll.u32 %s844_s3, 4  ;;  %s1178_s6 = int_to_ptr.vmem [resolvable:$true] %s655_s6 }
 0x27c   :  { %v508_v48 = vadd.f32 %v507_v44, %v488_v42  ;;  %s816_s7 = scalar_lea.vmem %s1178_s6, 2048  ;;  %p821_p1 = scmp.lt.s32.totalorder %s1178_s6, %s1178_s6 }
 0x27d   :  { %v496_v41 = vrot.slane %v495_v37, 4  ;;  %p817_p0 = scmp.ne.s32.totalorder %s1178_s6, %s816_s7  ;;  %p822_p2 = scmp.lt.s32.totalorder %s816_s7, %s816_s7 }
 0x27e   :  { %v509_v51 = vrot.slane %v508_v48, 4 }
 0x27f   :  { %v497_v47 = vadd.f32 %v496_v41, %v495_v37  ;;  %p823_p3 = por %p822_p2, %p821_p1 }
 0x280   :  { %v510_v53 = vadd.f32 %v509_v51, %v508_v48 }
 0x281   :  { %v498_v50 = vrot.slane %v497_v47, 2  ;;  %p824_p4 = pnand %p823_p3, %p817_p0 }
 0x282   :  { %v511_v59 = vrot.slane %v510_v53, 2 }
 0x283   :  { %v499_v52 = vadd.f32 %v498_v50, %v497_v47 }
 0x284   :  { %v512_v0 = vadd.f32 %v511_v59, %v510_v53 }
 0x285   :  { %v500_v56 = vrot.slane %v499_v52, 1 }
 0x286   :  { %v513_v3 = vrot.slane %v512_v0, 1 }
 0x287   :  { %v501_v62 = vadd.f32 %v500_v56, %v499_v52 }
 0x288   :  { %v514_v6 = vadd.f32 %v513_v3, %v512_v0 }
 0x289   :  { %v515_v2 = vmul.f32 0.015625, %v501_v62 }
 0x28a   :  { %v516_v8 = vmul.f32 0.015625, %v514_v6 }
 0x28b   :  { %v517_v5 = vadd.f32 1e-05, %v515_v2 }
 0x28c   :  { %v518_v10 = vadd.f32 1e-05, %v516_v8 }
 0x28d   :  { %812 = vrsqrt.f32 %v517_v5 }
 0x28e   :  { %814 = vrsqrt.f32 %v518_v10 }
 0x297   :  { %v813_v16 = vpop.eup %812 }
 0x298   :  { %v815_v19 = vpop.eup %814 }
 0x299   :  { %v524_v20 = vcombine.low %v813_v16, %v815_v19 }
 0x29b   :  { %v531_v21 = vrot.slane %v524_v20, %v530_v18 }
 0x29d   :  { %v538_v24 = vrot.slane %v531_v21, %v530_v18 }
 0x29f   :  { %v540_v26 = vmul.f32 %v538_v24, %v521_v23 }
 0x2a1   :  { %v547_v27 = vrot.slane %v540_v26, %v1055_v46  ;;  %v551_v28 = vrot.slane %v540_v26, %v1061_v49 }
 0x2a3   :  { %v554_v29 = vmul.f32 %v547_v27, %v1113_v40  ;;  %v555_v30 = vmul.f32 %v551_v28, %v1121_v45  ;;  %v575_v34 = vmul.f32 %v547_v27, %v1069_v57  ;;  %v576_v35 = vmul.f32 %v551_v28, %v1073_v60 }
 0x2a4   :  { %v577_v36 = vmul.f32 %v547_v27, %v1065_v54  ;;  %v578_v38 = vmul.f32 %v551_v28, %v1067_v55  ;;  %v579_v40 = vmul.f32 %v547_v27, %v1071_v58  ;;  %v580_v45 = vmul.f32 %v551_v28, %v1075_v61 }
 0x2a5   :  { %v558_v31 = vcombine.low %v554_v29, %v555_v30  ;;  %v581_v39 = vmul.f32 %v547_v27, %v1079_v63  ;;  %v582_v41 = vmul.f32 %v551_v28, %v1083_v1  ;;  %v583_v42 = vmul.f32 %v547_v27, %v1086_v4 }
 0x2a6   :  { %v584_v44 = vmul.f32 %v551_v28, %v1089_v7  ;;  %v585_v57 = vmul.f32 %v547_v27, %v1092_v9  ;;  %v586_v60 = vmul.f32 %v551_v28, %v1095_v11  ;;  %v587_v58 = vmul.f32 %v547_v27, %v1098_v14 }
 0x2a7   :  { %v565_v32 = vrot.slane %v558_v31, %v530_v18  ;;  %v588_v61 = vmul.f32 %v551_v28, %v1101_v17  ;;  %v589_v63 = vmul.f32 %v547_v27, %v1106_v22  ;;  %v590_v1 = vmul.f32 %v551_v28, %v1109_v25 }
 0x2a9   :  { %v572_v33 = vrot.slane %v565_v32, %v530_v18 }
 0x2ab   :  { %v574_v37 = vsub.f32 %v667_v43, %v572_v33 }
 0x2ad   :  { %v595_v54 = vrot.slane %v574_v37, %v1055_v46  ;;  %v599_v55 = vrot.slane %v574_v37, %v1061_v49 }
 0x2af   :  { %v602_v47 = vadd.f32 %v595_v54, %v575_v34  ;;  %v603_v4 = vadd.f32 %v599_v55, %v576_v35  ;;  %v604_v48 = vadd.f32 %v595_v54, %v577_v36  ;;  %v605_v7 = vadd.f32 %v599_v55, %v578_v38 }
 0x2b0   :  { %v606_v50 = vadd.f32 %v595_v54, %v579_v40  ;;  %v607_v9 = vadd.f32 %v599_v55, %v580_v45  ;;  %v608_v51 = vadd.f32 %v595_v54, %v581_v39  ;;  %v609_v11 = vadd.f32 %v599_v55, %v582_v41 }
 0x2b1   :  { %v610_v52 = vadd.f32 %v595_v54, %v583_v42  ;;  %v611_v46 = vadd.f32 %v599_v55, %v584_v44  ;;  %v612_v53 = vadd.f32 %v595_v54, %v585_v57  ;;  %v613_v49 = vadd.f32 %v599_v55, %v586_v60 }
 0x2b2   :  { %v614_v56 = vadd.f32 %v595_v54, %v587_v58  ;;  %v615_v14 = vadd.f32 %v599_v55, %v588_v61  ;;  %v616_v59 = vadd.f32 %v595_v54, %v589_v63  ;;  %v617_v17 = vadd.f32 %v599_v55, %v590_v1 }
 0x2b3   :  { %v618_v22 = vmax.f32 %v602_v47, 0.0  ;;  %v619_v25 = vmax.f32 %v603_v4, 0.0  ;;  %v620_v62 = vmax.f32 %v604_v48, 0.0  ;;  %v621_v0 = vmax.f32 %v605_v7, 0.0 }
 0x2b4   :  { %v622_v2 = vmax.f32 %v606_v50, 0.0  ;;  %v623_v3 = vmax.f32 %v607_v9, 0.0  ;;  %v624_v5 = vmax.f32 %v608_v51, 0.0  ;;  %v625_v6 = vmax.f32 %v609_v11, 0.0 }
 0x2b5   :  { %v626_v8 = vmax.f32 %v610_v52, 0.0  ;;  %v627_v10 = vmax.f32 %v611_v46, 0.0  ;;  %v628_v12 = vmax.f32 %v612_v53, 0.0  ;;  %v629_v13 = vmax.f32 %v613_v49, 0.0  ;;  %634 = vst [vmem:[#allocation2] sm:$0xff] %v618_v22  ;;  %635 = vst [vmem:[#allocation2 + $0x8] sm:$0xff] %v619_v25 }
 0x2b6   :  { %636 = vst [vmem:[#allocation2 + $0x10] sm:$0xff] %v620_v62  ;;  %637 = vst [vmem:[#allocation2 + $0x18] sm:$0xff] %v621_v0  ;;  %v630_v15 = vmax.f32 %v614_v56, 0.0  ;;  %v631_v16 = vmax.f32 %v615_v14, 0.0  ;;  %v632_v18 = vmax.f32 %v616_v59, 0.0  ;;  %v633_v19 = vmax.f32 %v617_v17, 0.0 }
 0x2b7   :  { %638 = vst [vmem:[#allocation2 + $0x20] sm:$0xff] %v622_v2  ;;  %639 = vst [vmem:[#allocation2 + $0x28] sm:$0xff] %v623_v3 }
 0x2b8   :  { %640 = vst [vmem:[#allocation2 + $0x30] sm:$0xff] %v624_v5  ;;  %641 = vst [vmem:[#allocation2 + $0x38] sm:$0xff] %v625_v6 }
 0x2b9   :  { %642 = vst [vmem:[#allocation2 + $0x40] sm:$0xff] %v626_v8  ;;  %643 = vst [vmem:[#allocation2 + $0x48] sm:$0xff] %v627_v10 }
 0x2ba   :  { %644 = vst [vmem:[#allocation2 + $0x50] sm:$0xff] %v628_v12  ;;  %645 = vst [vmem:[#allocation2 + $0x58] sm:$0xff] %v629_v13 }
 0x2bb   :  { %646 = vst [vmem:[#allocation2 + $0x60] sm:$0xff] %v630_v15  ;;  %647 = vst [vmem:[#allocation2 + $0x68] sm:$0xff] %v631_v16 }
 0x2bc   :  { %648 = vst [vmem:[#allocation2 + $0x70] sm:$0xff] %v632_v18  ;;  %649 = vst [vmem:[#allocation2 + $0x78] sm:$0xff] %v633_v19 }
 0x2bd   :  { %827 = shalt.err (!%p824_p4)
}
 0x2be   :  { %s828_s10 = scalar_lea.hbm %s1201_s4, 2048 }
 0x2bf   :  { %p829_p5 = scmp.ne.s32.totalorder %s1201_s4, %s828_s10  ;;  %p832_p6 = scmp.lt.u32.totalorder %s828_s10, %s1201_s4 }
 0x2c1   :  { %p834_p7 = pnand %p832_p6, %p829_p5 }
 0x2c3   :  { %837 = shalt.err (!%p834_p7)
}
 0x2c4   :  { %s845_s15 = smov 256   ;;  %s846_s16 = smov 16  }
 0x2c5   :  { %661 = dma.vmem_to_hbm [thread:$0]  %s1178_s6, 2048, %s1201_s4, [#allocation3], %s845_s15, %s845_s15, %s846_s16  }
 0x2c6   :  { %838 = dma.done.wait [#allocation3], 2048  }
 0x2c7   :  { %839 = vsyncadd [#allocation3], 4294965248 }
 0x2c8   :  { %665 = vsyncpa [#allocation3], 1 }

</bundles_post_ra>
